<compile_context>
chip_gen: v6e
topology: v6e:2x2x1
jax: 0.10.0
libtpu: 0.0.40
codegen_flags: <defaults>
</compile_context>

<pallas_src>
import functools

import jax
import jax.numpy as jnp
from jax.experimental import pallas as pl
from jax.experimental.pallas import tpu as pltpu

C1 = 0.01 ** 2
C2 = 0.03 ** 2


def _ssim_kernel(x_ref, y_ref, o_ref, *, period, approx_recip):
    # x_ref / y_ref: (B, H, Wp) planes in VMEM.  Wp may hold `Wp // period`
    # independent planes of true width `period` packed along the lane axis.
    B, H, Wp = x_ref.shape
    x = x_ref[...]
    y = y_ref[...]

    # ---- lane-only / row-only boundary masks (broadcast in jnp.where) ----
    col = jax.lax.broadcasted_iota(jnp.int32, (1, 1, Wp), 2)
    if period != Wp:
        col = col % period
    at_left = col == 0
    at_right = col == period - 1

    row = jax.lax.broadcasted_iota(jnp.int32, (1, H, 1), 1)
    at_top = row == 0
    at_bot = row == H - 1

    # ---- vertical (sublane / H) reflected neighbours: XLU rolls + edge fix --
    def vshift(p):
        up0 = pltpu.roll(p, 1, axis=1)        # up0[i] = p[i-1]   (wraps at 0)
        dn0 = pltpu.roll(p, H - 1, axis=1)    # dn0[i] = p[i+1]   (wraps at H-1)
        up = jnp.where(at_top, dn0, up0)      # row 0 reflect   -> p[1]
        dn = jnp.where(at_bot, up0, dn0)      # row H-1 reflect -> p[H-2]
        return up, dn

    x_up, x_dn = vshift(x)
    y_up, y_dn = vshift(y)

    # Vertical 3-tap (reflected) sums of the five products, sharing the
    # shifted x / y planes instead of re-shifting every product.
    vx = x + x_up + x_dn
    vy = y + y_up + y_dn
    vxx = x * x + x_up * x_up + x_dn * x_dn
    vyy = y * y + y_up * y_up + y_dn * y_dn
    vxy = x * y + x_up * y_up + x_dn * y_dn

    # ---- horizontal (lane / W) reflected 3-tap: XLU rolls + edge fix -------
    def hsum(v):
        prev = pltpu.roll(v, 1, axis=2)       # prev[j] = v[j-1] (wraps)
        nxt = pltpu.roll(v, Wp - 1, axis=2)   # nxt[j]  = v[j+1] (wraps)
        left = jnp.where(at_left, nxt, prev)  # col%W==0   needs v[j+1]
        right = jnp.where(at_right, prev, nxt)  # col%W==W-1 needs v[j-1]
        return v + left + right

    inv9 = 1.0 / 9.0
    mu_x = hsum(vx) * inv9
    mu_y = hsum(vy) * inv9
    sigma_x = hsum(vxx) * inv9 - mu_x * mu_x
    sigma_y = hsum(vyy) * inv9 - mu_y * mu_y
    sigma_xy = hsum(vxy) * inv9 - mu_x * mu_y

    ssim_n = (2.0 * mu_x * mu_y + C1) * (2.0 * sigma_xy + C2)
    ssim_d = (mu_x * mu_x + mu_y * mu_y + C1) * (sigma_x + sigma_y + C2)

    if approx_recip:
        # EUP reciprocal: fast but ~1e-3 relative error in the ratio.
        out = (1.0 - ssim_n * pl.reciprocal(ssim_d, approx=True)) * 0.5
    else:
        out = (1.0 - ssim_n / ssim_d) * 0.5
    o_ref[...] = jnp.clip(out, 0.0, 1.0)


def _vmem_estimate(b, h, w, itemsize):
    """Per-step VMEM: 3 I/O arrays x 2 buffers + ~12 block-sized temporaries."""
    blk = b * h * w * itemsize
    return (6 + 12) * blk


def _safe_vmem_cap():
    """75% of physical VMEM; defaults to the smallest generation (v7x, 64 MiB)."""
    try:
        capacity = int(pltpu.get_tpu_info().vmem_capacity_bytes)
    except Exception:  # not on TPU / interpret mode
        capacity = 64 * 1024 * 1024
    return capacity * 3 // 4


def _pick_plane_batch(nc, h, w, itemsize, vmem_cap):
    """Planes per grid step.

    Targets ~2-4 MiB input blocks, divides nc, keeps >=8 grid steps (>=4 per
    v7x TensorCore) when there are enough planes, prefers an even grid length,
    and respects the VMEM budget (I/O double buffers + in-kernel temporaries).
    """
    plane_bytes = max(1, h * w * itemsize)
    target_bytes = 4 << 20
    b = max(1, min(nc, target_bytes // plane_bytes))

    def shrink_to_divisor(val):
        val = max(1, val)
        while val > 1 and nc % val:
            val -= 1
        return val

    b = shrink_to_divisor(b)

    # >= 8 grid steps when possible.
    min_steps = 8
    if nc >= min_steps:
        while nc // b < min_steps:
            b = shrink_to_divisor(b - 1)

    # Prefer an even number of grid steps (2 TensorCores on v7x), but don't
    # shrink the block by more than 2x for it.
    if (nc // b) % 2 and nc % 2 == 0:
        bb = b
        while bb > 1 and ((nc % bb) or (nc // bb) % 2):
            bb -= 1
        if bb >= max(1, b // 2) and nc % bb == 0 and (nc // bb) % 2 == 0:
            b = bb

    # Respect the VMEM budget.
    while b > 1 and _vmem_estimate(b, h, w, itemsize) > vmem_cap:
        b = shrink_to_divisor(b - 1)
    return int(b)


def ssim(x, y, *, plane_batch=None, approx_recip=False):
    """SSIM loss. x, y: (N, C, H, W) float32. Returns (N, C, H, W)."""
    N, C, H, W = x.shape
    assert H >= 2 and W >= 2, "ReflectionPad2d(1) requires H, W >= 2"
    nc = N * C
    itemsize = x.dtype.itemsize

    # ---- pack k planes along the lane axis when W is lane-sparse ----------
    k = 1
    if W < 128:
        k = min(nc, -(-128 // W))  # ceil(128 / W)
        while nc % k:
            k -= 1
    ncp, Wp = nc // k, k * W

    def pack(a):
        a = a.reshape(ncp, k, H, W)
        return jnp.transpose(a, (0, 2, 1, 3)).reshape(ncp, H, Wp)

    if k > 1:
        xb = pack(x.reshape(nc, H, W))
        yb = pack(y.reshape(nc, H, W))
    else:
        xb = x.reshape(ncp, H, Wp)
        yb = y.reshape(ncp, H, Wp)

    # ---- block sizing & VMEM budgeting -------------------------------------
    cap = _safe_vmem_cap()
    B = plane_batch or _pick_plane_batch(ncp, H, Wp, itemsize, cap)
    while ncp % B:
        B -= 1
    grid = (ncp // B,)

    est = _vmem_estimate(B, H, Wp, itemsize)
    extra = {}
    if est > 16 * 1024 * 1024:  # above v5e's default scoped VMEM limit
        extra["vmem_limit_bytes"] = int(min(max(est * 5 // 4, 32 * 1024 * 1024), cap))

    io_spec = pl.BlockSpec((B, H, Wp), lambda i: (i, 0, 0))
    kernel = functools.partial(_ssim_kernel, period=W, approx_recip=approx_recip)

    out = pl.pallas_call(
        kernel,
        out_shape=jax.ShapeDtypeStruct((ncp, H, Wp), x.dtype),
        grid_spec=pltpu.PrefetchScalarGridSpec(
            num_scalar_prefetch=0,
            grid=grid,
            in_specs=[io_spec, io_spec],
            out_specs=io_spec,
        ),
        compiler_params=pltpu.CompilerParams(
            dimension_semantics=("parallel",), **extra
        ),
    )(xb, yb)

    if k > 1:
        out = out.reshape(ncp, H, k, W)
        out = jnp.transpose(out, (0, 2, 1, 3))
    return out.reshape(N, C, H, W)


def _ssim_ref(x, y):
    # pure-JAX reference (same math, using lax.reduce_window for the pool)
    xp = jnp.pad(x, ((0, 0), (0, 0), (1, 1), (1, 1)), mode="reflect")
    yp = jnp.pad(y, ((0, 0), (0, 0), (1, 1), (1, 1)), mode="reflect")

    def pool(a):
        return jax.lax.reduce_window(
            a, 0.0, jax.lax.add, (1, 1, 3, 3), (1, 1, 1, 1), "VALID"
        ) / 9.0

    mu_x = pool(xp)
    mu_y = pool(yp)
    sigma_x = pool(xp * xp) - mu_x * mu_x
    sigma_y = pool(yp * yp) - mu_y * mu_y
    sigma_xy = pool(xp * yp) - mu_x * mu_y
    n = (2 * mu_x * mu_y + C1) * (2 * sigma_xy + C2)
    d = (mu_x ** 2 + mu_y ** 2 + C1) * (sigma_x + sigma_y + C2)
    return jnp.clip((1 - n / d) / 2, 0.0, 1.0)


if __name__ == "__main__":
    key = jax.random.PRNGKey(0)
    kx, ky = jax.random.split(key)
    N, C, H, W = 2, 4, 16, 16
    x = jax.random.uniform(kx, (N, C, H, W), dtype=jnp.float32)
    y = jax.random.uniform(ky, (N, C, H, W), dtype=jnp.float32)

    out = ssim(x, y)
    jax.block_until_ready(out)

    ref = _ssim_ref(x, y)
    assert out.shape == (N, C, H, W)
    err = float(jnp.max(jnp.abs(out - ref)))
    assert jnp.allclose(out, ref, atol=1e-4, rtol=1e-4), err

    print("KERNEL_OK")
</pallas_src>

<mosaic_0001>
module attributes {stable_mosaic.version = 11 : i64} {
  func.func @_ssim_kernel(%arg0: i32, %arg1: memref<1x16x128xf32, #tpu.memory_space<vmem>>, %arg2: memref<1x16x128xf32, #tpu.memory_space<vmem>>, %arg3: memref<1x16x128xf32, #tpu.memory_space<vmem>>) attributes {dimension_semantics = [#tpu.dimension_semantics<parallel>], iteration_bounds = array<i64: 1>, scalar_prefetch = 0 : i64, scratch_operands = 0 : i64, tpu.core_type = #tpu.core_type<tc>, window_params = [{transform_indices = @transform_0, window_bounds = array<i64: 1, 16, 128>}, {transform_indices = @transform_1, window_bounds = array<i64: 1, 16, 128>}, {transform_indices = @transform_2, window_bounds = array<i64: 1, 16, 128>}]} {
    %c0 = arith.constant 0 : index
    %c0_0 = arith.constant 0 : index
    %c0_1 = arith.constant 0 : index
    %0 = vector.load %arg1[%c0, %c0_0, %c0_1] : memref<1x16x128xf32, #tpu.memory_space<vmem>>, vector<1x16x128xf32>
    %c0_2 = arith.constant 0 : index
    %c0_3 = arith.constant 0 : index
    %c0_4 = arith.constant 0 : index
    %1 = vector.load %arg2[%c0_2, %c0_3, %c0_4] : memref<1x16x128xf32, #tpu.memory_space<vmem>>, vector<1x16x128xf32>
    %2 = tpu.iota {dimensions = array<i32: 2>} : vector<1x1x128xi32>
    %c16_i32 = arith.constant 16 : i32
    %c0_i32 = arith.constant 0 : i32
    %3 = arith.cmpi eq, %c16_i32, %c0_i32 : i32
    %c1_i32 = arith.constant 1 : i32
    %4 = arith.select %3, %c1_i32, %c16_i32 : i32
    %5 = vector.broadcast %4 : i32 to vector<1x1x128xi32>
    %6 = arith.remsi %2, %5 : vector<1x1x128xi32>
    %c0_i32_5 = arith.constant 0 : i32
    %7 = vector.broadcast %c0_i32_5 : i32 to vector<1x1x128xi32>
    %8 = arith.cmpi ne, %6, %7 : vector<1x1x128xi32>
    %c0_i32_6 = arith.constant 0 : i32
    %9 = vector.broadcast %c0_i32_6 : i32 to vector<1x1x128xi32>
    %10 = arith.cmpi slt, %6, %9 : vector<1x1x128xi32>
    %c0_i32_7 = arith.constant 0 : i32
    %11 = arith.cmpi slt, %4, %c0_i32_7 : i32
    %12 = vector.broadcast %11 : i1 to vector<1x1x128xi1>
    %13 = vector.broadcast %12 : vector<1x1x128xi1> to vector<1x1x128xi1>
    %14 = arith.xori %10, %13 : vector<1x1x128xi1>
    %15 = arith.andi %14, %8 : vector<1x1x128xi1>
    %16 = vector.broadcast %4 : i32 to vector<1x1x128xi32>
    %17 = arith.addi %6, %16 : vector<1x1x128xi32>
    %18 = arith.select %15, %17, %6 : vector<1x1x128xi1>, vector<1x1x128xi32>
    %c0_i32_8 = arith.constant 0 : i32
    %19 = vector.broadcast %c0_i32_8 : i32 to vector<1x1x128xi32>
    %20 = arith.cmpi eq, %18, %19 : vector<1x1x128xi32>
    %c15_i32 = arith.constant 15 : i32
    %21 = vector.broadcast %c15_i32 : i32 to vector<1x1x128xi32>
    %22 = arith.cmpi eq, %18, %21 : vector<1x1x128xi32>
    %23 = tpu.iota {dimensions = array<i32: 1>} : vector<1x16x1xi32>
    %c0_i32_9 = arith.constant 0 : i32
    %24 = vector.broadcast %c0_i32_9 : i32 to vector<1x16x1xi32>
    %25 = arith.cmpi eq, %23, %24 : vector<1x16x1xi32>
    %c15_i32_10 = arith.constant 15 : i32
    %26 = vector.broadcast %c15_i32_10 : i32 to vector<1x16x1xi32>
    %27 = arith.cmpi eq, %23, %26 : vector<1x16x1xi32>
    %c1_i32_11 = arith.constant 1 : i32
    %28 = tpu.dynamic_rotate %0 by %c1_i32_11 dim 1 : vector<1x16x128xf32>, i32 -> vector<1x16x128xf32>
    %c15_i32_12 = arith.constant 15 : i32
    %29 = tpu.dynamic_rotate %0 by %c15_i32_12 dim 1 : vector<1x16x128xf32>, i32 -> vector<1x16x128xf32>
    %30 = vector.shape_cast %25 : vector<1x16x1xi1> to vector<1x16x1xi1>
    %31 = vector.broadcast %30 : vector<1x16x1xi1> to vector<1x16x128xi1>
    %32 = arith.select %31, %29, %28 : vector<1x16x128xi1>, vector<1x16x128xf32>
    %33 = vector.shape_cast %27 : vector<1x16x1xi1> to vector<1x16x1xi1>
    %34 = vector.broadcast %33 : vector<1x16x1xi1> to vector<1x16x128xi1>
    %35 = arith.select %34, %28, %29 : vector<1x16x128xi1>, vector<1x16x128xf32>
    %c1_i32_13 = arith.constant 1 : i32
    %36 = tpu.dynamic_rotate %1 by %c1_i32_13 dim 1 : vector<1x16x128xf32>, i32 -> vector<1x16x128xf32>
    %c15_i32_14 = arith.constant 15 : i32
    %37 = tpu.dynamic_rotate %1 by %c15_i32_14 dim 1 : vector<1x16x128xf32>, i32 -> vector<1x16x128xf32>
    %38 = vector.shape_cast %25 : vector<1x16x1xi1> to vector<1x16x1xi1>
    %39 = vector.broadcast %38 : vector<1x16x1xi1> to vector<1x16x128xi1>
    %40 = arith.select %39, %37, %36 : vector<1x16x128xi1>, vector<1x16x128xf32>
    %41 = vector.shape_cast %27 : vector<1x16x1xi1> to vector<1x16x1xi1>
    %42 = vector.broadcast %41 : vector<1x16x1xi1> to vector<1x16x128xi1>
    %43 = arith.select %42, %36, %37 : vector<1x16x128xi1>, vector<1x16x128xf32>
    %44 = arith.addf %0, %32 : vector<1x16x128xf32>
    %45 = arith.addf %44, %35 : vector<1x16x128xf32>
    %46 = arith.addf %1, %40 : vector<1x16x128xf32>
    %47 = arith.addf %46, %43 : vector<1x16x128xf32>
    %48 = arith.mulf %0, %0 : vector<1x16x128xf32>
    %49 = arith.mulf %32, %32 : vector<1x16x128xf32>
    %50 = arith.addf %48, %49 : vector<1x16x128xf32>
    %51 = arith.mulf %35, %35 : vector<1x16x128xf32>
    %52 = arith.addf %50, %51 : vector<1x16x128xf32>
    %53 = arith.mulf %1, %1 : vector<1x16x128xf32>
    %54 = arith.mulf %40, %40 : vector<1x16x128xf32>
    %55 = arith.addf %53, %54 : vector<1x16x128xf32>
    %56 = arith.mulf %43, %43 : vector<1x16x128xf32>
    %57 = arith.addf %55, %56 : vector<1x16x128xf32>
    %58 = arith.mulf %0, %1 : vector<1x16x128xf32>
    %59 = arith.mulf %32, %40 : vector<1x16x128xf32>
    %60 = arith.addf %58, %59 : vector<1x16x128xf32>
    %61 = arith.mulf %35, %43 : vector<1x16x128xf32>
    %62 = arith.addf %60, %61 : vector<1x16x128xf32>
    %c1_i32_15 = arith.constant 1 : i32
    %63 = tpu.dynamic_rotate %45 by %c1_i32_15 dim 2 : vector<1x16x128xf32>, i32 -> vector<1x16x128xf32>
    %c127_i32 = arith.constant 127 : i32
    %64 = tpu.dynamic_rotate %45 by %c127_i32 dim 2 : vector<1x16x128xf32>, i32 -> vector<1x16x128xf32>
    %65 = vector.shape_cast %20 : vector<1x1x128xi1> to vector<1x1x128xi1>
    %66 = vector.broadcast %65 : vector<1x1x128xi1> to vector<1x16x128xi1>
    %67 = arith.select %66, %64, %63 : vector<1x16x128xi1>, vector<1x16x128xf32>
    %68 = vector.shape_cast %22 : vector<1x1x128xi1> to vector<1x1x128xi1>
    %69 = vector.broadcast %68 : vector<1x1x128xi1> to vector<1x16x128xi1>
    %70 = arith.select %69, %63, %64 : vector<1x16x128xi1>, vector<1x16x128xf32>
    %71 = arith.addf %45, %67 : vector<1x16x128xf32>
    %72 = arith.addf %71, %70 : vector<1x16x128xf32>
    %cst = arith.constant 0.111111112 : f32
    %73 = vector.broadcast %cst : f32 to vector<1x16x128xf32>
    %74 = arith.mulf %72, %73 : vector<1x16x128xf32>
    %c1_i32_16 = arith.constant 1 : i32
    %75 = tpu.dynamic_rotate %47 by %c1_i32_16 dim 2 : vector<1x16x128xf32>, i32 -> vector<1x16x128xf32>
    %c127_i32_17 = arith.constant 127 : i32
    %76 = tpu.dynamic_rotate %47 by %c127_i32_17 dim 2 : vector<1x16x128xf32>, i32 -> vector<1x16x128xf32>
    %77 = vector.shape_cast %20 : vector<1x1x128xi1> to vector<1x1x128xi1>
    %78 = vector.broadcast %77 : vector<1x1x128xi1> to vector<1x16x128xi1>
    %79 = arith.select %78, %76, %75 : vector<1x16x128xi1>, vector<1x16x128xf32>
    %80 = vector.shape_cast %22 : vector<1x1x128xi1> to vector<1x1x128xi1>
    %81 = vector.broadcast %80 : vector<1x1x128xi1> to vector<1x16x128xi1>
    %82 = arith.select %81, %75, %76 : vector<1x16x128xi1>, vector<1x16x128xf32>
    %83 = arith.addf %47, %79 : vector<1x16x128xf32>
    %84 = arith.addf %83, %82 : vector<1x16x128xf32>
    %cst_18 = arith.constant 0.111111112 : f32
    %85 = vector.broadcast %cst_18 : f32 to vector<1x16x128xf32>
    %86 = arith.mulf %84, %85 : vector<1x16x128xf32>
    %c1_i32_19 = arith.constant 1 : i32
    %87 = tpu.dynamic_rotate %52 by %c1_i32_19 dim 2 : vector<1x16x128xf32>, i32 -> vector<1x16x128xf32>
    %c127_i32_20 = arith.constant 127 : i32
    %88 = tpu.dynamic_rotate %52 by %c127_i32_20 dim 2 : vector<1x16x128xf32>, i32 -> vector<1x16x128xf32>
    %89 = vector.shape_cast %20 : vector<1x1x128xi1> to vector<1x1x128xi1>
    %90 = vector.broadcast %89 : vector<1x1x128xi1> to vector<1x16x128xi1>
    %91 = arith.select %90, %88, %87 : vector<1x16x128xi1>, vector<1x16x128xf32>
    %92 = vector.shape_cast %22 : vector<1x1x128xi1> to vector<1x1x128xi1>
    %93 = vector.broadcast %92 : vector<1x1x128xi1> to vector<1x16x128xi1>
    %94 = arith.select %93, %87, %88 : vector<1x16x128xi1>, vector<1x16x128xf32>
    %95 = arith.addf %52, %91 : vector<1x16x128xf32>
    %96 = arith.addf %95, %94 : vector<1x16x128xf32>
    %cst_21 = arith.constant 0.111111112 : f32
    %97 = vector.broadcast %cst_21 : f32 to vector<1x16x128xf32>
    %98 = arith.mulf %96, %97 : vector<1x16x128xf32>
    %99 = arith.mulf %74, %74 : vector<1x16x128xf32>
    %100 = arith.subf %98, %99 : vector<1x16x128xf32>
    %c1_i32_22 = arith.constant 1 : i32
    %101 = tpu.dynamic_rotate %57 by %c1_i32_22 dim 2 : vector<1x16x128xf32>, i32 -> vector<1x16x128xf32>
    %c127_i32_23 = arith.constant 127 : i32
    %102 = tpu.dynamic_rotate %57 by %c127_i32_23 dim 2 : vector<1x16x128xf32>, i32 -> vector<1x16x128xf32>
    %103 = vector.shape_cast %20 : vector<1x1x128xi1> to vector<1x1x128xi1>
    %104 = vector.broadcast %103 : vector<1x1x128xi1> to vector<1x16x128xi1>
    %105 = arith.select %104, %102, %101 : vector<1x16x128xi1>, vector<1x16x128xf32>
    %106 = vector.shape_cast %22 : vector<1x1x128xi1> to vector<1x1x128xi1>
    %107 = vector.broadcast %106 : vector<1x1x128xi1> to vector<1x16x128xi1>
    %108 = arith.select %107, %101, %102 : vector<1x16x128xi1>, vector<1x16x128xf32>
    %109 = arith.addf %57, %105 : vector<1x16x128xf32>
    %110 = arith.addf %109, %108 : vector<1x16x128xf32>
    %cst_24 = arith.constant 0.111111112 : f32
    %111 = vector.broadcast %cst_24 : f32 to vector<1x16x128xf32>
    %112 = arith.mulf %110, %111 : vector<1x16x128xf32>
    %113 = arith.mulf %86, %86 : vector<1x16x128xf32>
    %114 = arith.subf %112, %113 : vector<1x16x128xf32>
    %c1_i32_25 = arith.constant 1 : i32
    %115 = tpu.dynamic_rotate %62 by %c1_i32_25 dim 2 : vector<1x16x128xf32>, i32 -> vector<1x16x128xf32>
    %c127_i32_26 = arith.constant 127 : i32
    %116 = tpu.dynamic_rotate %62 by %c127_i32_26 dim 2 : vector<1x16x128xf32>, i32 -> vector<1x16x128xf32>
    %117 = vector.shape_cast %20 : vector<1x1x128xi1> to vector<1x1x128xi1>
    %118 = vector.broadcast %117 : vector<1x1x128xi1> to vector<1x16x128xi1>
    %119 = arith.select %118, %116, %115 : vector<1x16x128xi1>, vector<1x16x128xf32>
    %120 = vector.shape_cast %22 : vector<1x1x128xi1> to vector<1x1x128xi1>
    %121 = vector.broadcast %120 : vector<1x1x128xi1> to vector<1x16x128xi1>
    %122 = arith.select %121, %115, %116 : vector<1x16x128xi1>, vector<1x16x128xf32>
    %123 = arith.addf %62, %119 : vector<1x16x128xf32>
    %124 = arith.addf %123, %122 : vector<1x16x128xf32>
    %cst_27 = arith.constant 0.111111112 : f32
    %125 = vector.broadcast %cst_27 : f32 to vector<1x16x128xf32>
    %126 = arith.mulf %124, %125 : vector<1x16x128xf32>
    %127 = arith.mulf %74, %86 : vector<1x16x128xf32>
    %128 = arith.subf %126, %127 : vector<1x16x128xf32>
    %cst_28 = arith.constant 2.000000e+00 : f32
    %129 = vector.broadcast %cst_28 : f32 to vector<1x16x128xf32>
    %130 = arith.mulf %129, %74 : vector<1x16x128xf32>
    %131 = arith.mulf %130, %86 : vector<1x16x128xf32>
    %cst_29 = arith.constant 9.99999974E-5 : f32
    %132 = vector.broadcast %cst_29 : f32 to vector<1x16x128xf32>
    %133 = arith.addf %131, %132 : vector<1x16x128xf32>
    %cst_30 = arith.constant 2.000000e+00 : f32
    %134 = vector.broadcast %cst_30 : f32 to vector<1x16x128xf32>
    %135 = arith.mulf %134, %128 : vector<1x16x128xf32>
    %cst_31 = arith.constant 8.99999984E-4 : f32
    %136 = vector.broadcast %cst_31 : f32 to vector<1x16x128xf32>
    %137 = arith.addf %135, %136 : vector<1x16x128xf32>
    %138 = arith.mulf %133, %137 : vector<1x16x128xf32>
    %139 = arith.mulf %74, %74 : vector<1x16x128xf32>
    %140 = arith.mulf %86, %86 : vector<1x16x128xf32>
    %141 = arith.addf %139, %140 : vector<1x16x128xf32>
    %cst_32 = arith.constant 9.99999974E-5 : f32
    %142 = vector.broadcast %cst_32 : f32 to vector<1x16x128xf32>
    %143 = arith.addf %141, %142 : vector<1x16x128xf32>
    %144 = arith.addf %100, %114 : vector<1x16x128xf32>
    %cst_33 = arith.constant 8.99999984E-4 : f32
    %145 = vector.broadcast %cst_33 : f32 to vector<1x16x128xf32>
    %146 = arith.addf %144, %145 : vector<1x16x128xf32>
    %147 = arith.mulf %143, %146 : vector<1x16x128xf32>
    %148 = arith.divf %138, %147 : vector<1x16x128xf32>
    %cst_34 = arith.constant 1.000000e+00 : f32
    %149 = vector.broadcast %cst_34 : f32 to vector<1x16x128xf32>
    %150 = arith.subf %149, %148 : vector<1x16x128xf32>
    %cst_35 = arith.constant 5.000000e-01 : f32
    %151 = vector.broadcast %cst_35 : f32 to vector<1x16x128xf32>
    %152 = arith.mulf %150, %151 : vector<1x16x128xf32>
    %cst_36 = arith.constant 0.000000e+00 : f32
    %cst_37 = arith.constant 1.000000e+00 : f32
    %153 = vector.broadcast %cst_36 : f32 to vector<1x16x128xf32>
    %154 = arith.maximumf %153, %152 : vector<1x16x128xf32>
    %155 = vector.broadcast %cst_37 : f32 to vector<1x16x128xf32>
    %156 = arith.minimumf %155, %154 : vector<1x16x128xf32>
    %c0_38 = arith.constant 0 : index
    %c0_39 = arith.constant 0 : index
    %c0_40 = arith.constant 0 : index
    %157 = vector.load %arg3[%c0_38, %c0_39, %c0_40] : memref<1x16x128xf32, #tpu.memory_space<vmem>>, vector<1x16x128xf32>
    tpu.vector_store %arg3[%c0_38, %c0_39, %c0_40], %156 {strides = array<i32>} : memref<1x16x128xf32, #tpu.memory_space<vmem>>, vector<1x16x128xf32>,
    return
  }
  func.func @transform_0(%arg0: i32) -> (i32, i32, i32) {
    %c0_i32 = arith.constant 0 : i32
    %c0_i32_0 = arith.constant 0 : i32
    %c0_i32_1 = arith.constant 0 : i32
    return %arg0, %c0_i32, %c0_i32_0 : i32, i32, i32
  }
  func.func @transform_1(%arg0: i32) -> (i32, i32, i32) {
    %c0_i32 = arith.constant 0 : i32
    %c0_i32_0 = arith.constant 0 : i32
    %c0_i32_1 = arith.constant 0 : i32
    return %arg0, %c0_i32, %c0_i32_0 : i32, i32, i32
  }
  func.func @transform_2(%arg0: i32) -> (i32, i32, i32) {
    %c0_i32 = arith.constant 0 : i32
    %c0_i32_0 = arith.constant 0 : i32
    %c0_i32_1 = arith.constant 0 : i32
    return %arg0, %c0_i32, %c0_i32_0 : i32, i32, i32
  }
}

</mosaic_0001>

<bundles_post_ra>
// kernel: tpu_custom_call.1
= control target key start
LH: loop header
LB: loop body
LE: loop exit
PB: predicated region body
PF: predicated region fallthrough
CT: control target
= control target key end

     0   :  { %7 = vsyncpa [#allocation3], 0  ;;  %s584_s0 = inlined_call_operand.hbm [shape: f32[1,16,128], index: 0, kind: input, shape index: {}]   ;;  %s585_s1 = inlined_call_operand.hbm [shape: f32[1,16,128], index: 1, kind: input, shape index: {}]   ;;  %s586_s2 = inlined_call_operand.hbm [shape: f32[1,16,128], index: 2, kind: output, shape index: {}]  }
   0x1   :  { %8 = vsyncpa [#allocation6], 0 }
   0x2   :  { %9 = vsyncpa [#allocation4], 0  ;;  %s376_s9 = smov [#allocation2]  }
   0x3   :  { %s15_s10 = sshll.u32 %s376_s9, 4  ;;  %s16_s10 = int_to_ptr.vmem [resolvable:$true] %s15_s10 }
   0x4   :  { %s318_s11 = scalar_lea.vmem %s16_s10, 256  ;;  %p323_p1 = scmp.lt.s32.totalorder %s16_s10, %s16_s10 }
   0x5   :  { %p319_p0 = scmp.ne.s32.totalorder %s16_s10, %s318_s11  ;;  %p324_p2 = scmp.lt.s32.totalorder %s318_s11, %s318_s11 }
   0x7   :  { %p325_p3 = por %p324_p2, %p323_p1 }
   0x9   :  { %p326_p4 = pnand %p325_p3, %p319_p0 }
   0xb   :  { %329 = shalt.err (!%p326_p4)
}
   0xc   :  { %s377_s12 = smov 128   ;;  %s378_s13 = smov 8  }
   0xd   :  { %21 = dma.hbm_to_vmem [thread:$0]  %s584_s0, 256, %s16_s10, [#allocation3], %s377_s12, %s377_s12, %s378_s13  }
   0xe   :  { %s379_s16 = smov [#allocation5]  }
   0xf   :  { %s27_s17 = sshll.u32 %s379_s16, 4  ;;  %s28_s17 = int_to_ptr.vmem [resolvable:$true] %s27_s17 }
  0x10   :  { %s338_s18 = scalar_lea.vmem %s28_s17, 256  ;;  %p343_p6 = scmp.lt.s32.totalorder %s28_s17, %s28_s17 }
  0x11   :  { %p339_p5 = scmp.ne.s32.totalorder %s28_s17, %s338_s18  ;;  %p344_p7 = scmp.lt.s32.totalorder %s338_s18, %s338_s18 }
  0x13   :  { %p345_p8 = por %p344_p7, %p343_p6 }
  0x15   :  { %p346_p9 = pnand %p345_p8, %p339_p5 }
  0x17   :  { %349 = shalt.err (!%p346_p9)
}
  0x18   :  { %33 = dma.hbm_to_vmem [thread:$0]  %s585_s1, 256, %s28_s17, [#allocation6], %s377_s12, %s377_s12, %s378_s13  }
  0x19   :  { %370 = dma.done.wait [#allocation3], 256  }
  0x1a   :  { %371 = vsyncadd [#allocation3], 4294967040 }
  0x1b   :  { %372 = dma.done.wait [#allocation6], 256  }
  0x1c   :  { %373 = vsyncadd [#allocation6], 4294967040  ;;  %v44_v0 = vlaneseq  ;;  %v411_v3 = vld [vmem:[#allocation2] sm:$0xff]  ;;  %v413_v4 = vld [vmem:[#allocation2 + $0x8] sm:$0xff]  ;;  %s380_s0 = smov 127   ;;  %s381_s1 = smov 1  }
  0x1d   :  { %v415_v5 = vld [vmem:[#allocation5] sm:$0xff]  ;;  %v67_v6 = vrot.slane %v411_v3, 7  ;;  %v68_v7 = vrot.slane %v413_v4, 7  ;;  %v72_v8 = vrot.slane %v411_v3, 1  ;;  %v73_v9 = vrot.slane %v413_v4, 1  ;;  %v43_v10 = vld [vmem:[#allocation5 + $0x8] sm:$0xff] }
  0x1e   :  { %v61_v1 = vshrl.u32 %v44_v0, 7  ;;  %v89_v11 = vrot.slane %v415_v5, 7  ;;  %v90_v12 = vrot.slane %v43_v10, 7  ;;  %v93_v13 = vrot.slane %v415_v5, 1  ;;  %s382_s21 = smov [#allocation7]  }
  0x1f   :  { %v94_v14 = vrot.slane %v43_v10, 1  ;;  %v110_v34 = vmul.f32 %v413_v4, %v413_v4  ;;  %v109_v37 = vmul.f32 %v411_v3, %v411_v3  ;;  %v120_v43 = vmul.f32 %v43_v10, %v43_v10  ;;  %s286_s22 = sshll.u32 %s382_s21, 4  ;;  %s287_s22 = int_to_ptr.vmem [resolvable:$true] %s286_s22 }
  0x20   :  { %v62_v2 = vadd.s32 8, %v61_v1  ;;  %vm69_vm0 = vcmp.lt.s32.totalorder %v61_v1, 1  ;;  %vm74_vm2 = vcmp.lt.s32.totalorder %v61_v1, 7  ;;  %vm63_vm3 = vcmp.eq.s32.totalorder %v61_v1, 0  ;;  %s350_s23 = scalar_lea.vmem %s287_s22, 256  ;;  %p355_p11 = scmp.lt.s32.totalorder %s287_s22, %s287_s22 }
  0x21   :  { %v70_v15 = vsel %vm69_vm0, %v67_v6, %v68_v7  ;;  %v76_v16 = vsel %vm74_vm2, %v73_v9, %v72_v8  ;;  %v71_v17 = vsel %vm69_vm0, %v68_v7, %v67_v6  ;;  %v75_v18 = vsel %vm74_vm2, %v72_v8, %v73_v9  ;;  %p351_p10 = scmp.ne.s32.totalorder %s287_s22, %s350_s23  ;;  %p356_p12 = scmp.lt.s32.totalorder %s350_s23, %s350_s23 }
  0x22   :  { %vm66_vm1 = vcmp.eq.s32.totalorder %v62_v2, 15  ;;  %v102_v20 = vadd.f32 %v70_v15, %v413_v4  ;;  %v91_v21 = vsel %vm69_vm0, %v89_v11, %v90_v12  ;;  %v96_v22 = vsel %vm74_vm2, %v94_v14, %v93_v13 }
  0x23   :  { %v88_v19 = vsel %vm66_vm1, %v70_v15, %v76_v16  ;;  %v100_v23 = vsel %vm66_vm1, %v91_v21, %v96_v22  ;;  %v106_v24 = vadd.f32 %v91_v21, %v43_v10  ;;  %v81_v25 = vsel %vm63_vm3, %v75_v18, %v71_v17  ;;  %p357_p13 = por %p356_p12, %p355_p11 }
  0x24   :  { %v92_v26 = vsel %vm69_vm0, %v90_v12, %v89_v11  ;;  %v434_v27 = vadd.f32 %v102_v20, %v88_v19  ;;  %v101_v28 = vadd.f32 %v81_v25, %v411_v3  ;;  %v95_v29 = vsel %vm74_vm2, %v93_v13, %v94_v14 }
  0x25   :  { %v97_v30 = vsel %vm63_vm3, %v95_v29, %v92_v26  ;;  %v443_v31 = vadd.f32 %v106_v24, %v100_v23  ;;  %v112_v35 = vmul.f32 %v70_v15, %v70_v15  ;;  %v111_v38 = vmul.f32 %v81_v25, %v81_v25  ;;  %p358_p0 = pnand %p357_p13, %p351_p10 }
  0x26   :  { %145 = vrot.lane.b32.xlu1 %v434_v27, %s380_s0  ;;  %141 = vrot.lane.b32.xlu0 %v434_v27, %s381_s1  ;;  %v445_v32 = vadd.f32 %v101_v28, %v75_v18  ;;  %v105_v33 = vadd.f32 %v97_v30, %v415_v5  ;;  %v116_v39 = vmul.f32 %v88_v19, %v88_v19  ;;  %v45_v6 = vand.u32 127, %v44_v0 }
  0x27   :  { %v114_v40 = vadd.f32 %v112_v35, %v110_v34  ;;  %v113_v41 = vadd.f32 %v111_v38, %v109_v37  ;;  %v115_v42 = vmul.f32 %v75_v18, %v75_v18  ;;  %v122_v44 = vmul.f32 %v91_v21, %v91_v21 }
  0x28   :  { %v454_v36 = vadd.f32 %v105_v33, %v95_v29  ;;  %v119_v45 = vmul.f32 %v415_v5, %v415_v5  ;;  %v121_v48 = vmul.f32 %v97_v30, %v97_v30  ;;  %v126_v49 = vmul.f32 %v100_v23, %v100_v23 }
  0x29   :  { %v468_v46 = vadd.f32 %v116_v39, %v114_v40  ;;  %v470_v47 = vadd.f32 %v115_v42, %v113_v41  ;;  %v124_v50 = vadd.f32 %v122_v44, %v120_v43  ;;  %v125_v52 = vmul.f32 %v95_v29, %v95_v29 }
  0x2a   :  { %163 = vrot.lane.b32.xlu1 %v443_v31, %s381_s1  ;;  %139 = vrot.lane.b32.xlu0 %v445_v32, %s381_s1  ;;  %v123_v51 = vadd.f32 %v121_v48, %v119_v45  ;;  %v130_v53 = vmul.f32 %v43_v10, %v413_v4  ;;  %v132_v54 = vmul.f32 %v91_v21, %v70_v15  ;;  %v50_v9 = vand.u32 15, %v45_v6 }
  0x2b   :  { %v129_v55 = vmul.f32 %v415_v5, %v411_v3  ;;  %v483_v56 = vadd.f32 %v126_v49, %v124_v50  ;;  %v131_v58 = vmul.f32 %v97_v30, %v81_v25  ;;  %v136_v59 = vmul.f32 %v100_v23, %v88_v19 }
  0x2c   :  { %v485_v57 = vadd.f32 %v125_v52, %v123_v51  ;;  %v134_v60 = vadd.f32 %v132_v54, %v130_v53  ;;  %v135_v62 = vmul.f32 %v95_v29, %v75_v18  ;;  %vm508_vm4 = vcmp.eq.s32.totalorder %v50_v9, 0 }
  0x2d   :  { %v133_v61 = vadd.f32 %v131_v58, %v129_v55  ;;  %vm523_vm5 = vcmp.eq.s32.totalorder %v50_v9, 15 }
  0x2e   :  { %167 = vrot.lane.b32.xlu1 %v443_v31, %s380_s0  ;;  %161 = vrot.lane.b32.xlu0 %v454_v36, %s381_s1  ;;  %v495_v63 = vadd.f32 %v136_v59, %v134_v60 }
  0x2f   :  { %v497_v1 = vadd.f32 %v135_v62, %v133_v61 }
  0x32   :  { %143 = vrot.lane.b32.xlu1 %v445_v32, %s380_s0  ;;  %165 = vrot.lane.b32.xlu0 %v454_v36, %s380_s0 }
  0x36   :  { %181 = vrot.lane.b32.xlu1 %v468_v46, %s381_s1  ;;  %179 = vrot.lane.b32.xlu0 %v470_v47, %s381_s1 }
  0x3a   :  { %185 = vrot.lane.b32.xlu1 %v468_v46, %s380_s0  ;;  %183 = vrot.lane.b32.xlu0 %v470_v47, %s380_s0 }
  0x3e   :  { %203 = vrot.lane.b32.xlu1 %v483_v56, %s381_s1  ;;  %201 = vrot.lane.b32.xlu0 %v485_v57, %s381_s1 }
  0x42   :  { %207 = vrot.lane.b32.xlu1 %v483_v56, %s380_s0  ;;  %205 = vrot.lane.b32.xlu0 %v485_v57, %s380_s0 }
  0x46   :  { %225 = vrot.lane.b32.xlu1 %v495_v63, %s381_s1  ;;  %223 = vrot.lane.b32.xlu0 %v497_v1, %s381_s1 }
  0x4a   :  { %229 = vrot.lane.b32.xlu1 %v495_v63, %s380_s0  ;;  %227 = vrot.lane.b32.xlu0 %v497_v1, %s380_s0 }
  0x98   :  { %v146_v2 = vpop.permute.xlu1 %145  ;;  %v142_v3 = vpop.permute.xlu0 %141 }
  0x99   :  { %v150_v17 = vsel %vm508_vm4, %v146_v2, %v142_v3 }
  0x9a   :  { %v156_v24 = vadd.f32 %v150_v17, %v434_v27  ;;  %v154_v27 = vsel %vm523_vm5, %v142_v3, %v146_v2 }
  0x9c   :  { %v164_v4 = vpop.permute.xlu1 %163  ;;  %v140_v5 = vpop.permute.xlu0 %139  ;;  %v158_v38 = vadd.f32 %v156_v24, %v154_v27 }
  0x9e   :  { %v160_v49 = vmul.f32 0.11111111, %v158_v38 }
  0xa0   :  { %v168_v7 = vpop.permute.xlu1 %167  ;;  %v162_v8 = vpop.permute.xlu0 %161 }
  0xa1   :  { %v170_v13 = vsel %vm508_vm4, %v168_v7, %v164_v4  ;;  %v172_v25 = vsel %vm523_vm5, %v164_v4, %v168_v7 }
  0xa2   :  { %v174_v18 = vadd.f32 %v170_v13, %v443_v31 }
  0xa4   :  { %v144_v10 = vpop.permute.xlu1 %143  ;;  %v166_v11 = vpop.permute.xlu0 %165  ;;  %v176_v29 = vadd.f32 %v174_v18, %v172_v25 }
  0xa5   :  { %v149_v14 = vsel %vm508_vm4, %v144_v10, %v140_v5  ;;  %v169_v15 = vsel %vm508_vm4, %v166_v11, %v162_v8  ;;  %v153_v30 = vsel %vm523_vm5, %v140_v5, %v144_v10  ;;  %v171_v31 = vsel %vm523_vm5, %v162_v8, %v166_v11 }
  0xa6   :  { %v155_v19 = vadd.f32 %v149_v14, %v445_v32  ;;  %v173_v20 = vadd.f32 %v169_v15, %v454_v36  ;;  %v542_v39 = vmul.f32 0.11111111, %v176_v29  ;;  %v198_v5 = vmul.f32 %v160_v49, %v160_v49 }
  0xa8   :  { %v182_v16 = vpop.permute.xlu1 %181  ;;  %v180_v0 = vpop.permute.xlu0 %179  ;;  %v157_v32 = vadd.f32 %v155_v19, %v153_v30  ;;  %v175_v33 = vadd.f32 %v173_v20, %v171_v31  ;;  %v220_v51 = vmul.f32 %v542_v39, %v542_v39  ;;  %v242_v30 = vmul.f32 %v542_v39, %v160_v49 }
  0xaa   :  { %v159_v40 = vmul.f32 0.11111111, %v157_v32  ;;  %v544_v41 = vmul.f32 0.11111111, %v175_v33 }
  0xac   :  { %v186_v22 = vpop.permute.xlu1 %185  ;;  %v184_v23 = vpop.permute.xlu0 %183  ;;  %v197_v54 = vmul.f32 %v159_v40, %v159_v40  ;;  %v219_v58 = vmul.f32 %v544_v41, %v544_v41  ;;  %v241_v21 = vmul.f32 %v544_v41, %v159_v40 }
  0xad   :  { %v188_v26 = vsel %vm508_vm4, %v186_v22, %v182_v16  ;;  %v187_v28 = vsel %vm508_vm4, %v184_v23, %v180_v0  ;;  %v190_v42 = vsel %vm523_vm5, %v182_v16, %v186_v22  ;;  %v189_v43 = vsel %vm523_vm5, %v180_v0, %v184_v23 }
  0xae   :  { %v192_v34 = vadd.f32 %v188_v26, %v468_v46  ;;  %v191_v35 = vadd.f32 %v187_v28, %v470_v47  ;;  %v257_v7 = vadd.f32 %v219_v58, %v197_v54 }
  0xb0   :  { %v204_v36 = vpop.permute.xlu1 %203  ;;  %v202_v37 = vpop.permute.xlu0 %201  ;;  %v194_v44 = vadd.f32 %v192_v34, %v190_v42  ;;  %v193_v45 = vadd.f32 %v191_v35, %v189_v43  ;;  %v259_v24 = vadd.f32 0.0001, %v257_v7  ;;  %v245_v34 = vmul.f32 2.0, %v159_v40 }
  0xb2   :  { %v196_v60 = vmul.f32 0.11111111, %v194_v44  ;;  %v195_v61 = vmul.f32 0.11111111, %v193_v45  ;;  %v247_v38 = vmul.f32 %v245_v34, %v544_v41 }
  0xb4   :  { %v208_v48 = vpop.permute.xlu1 %207  ;;  %v206_v46 = vpop.permute.xlu0 %205  ;;  %v200_v8 = vsub.f32 %v196_v60, %v198_v5  ;;  %v199_v9 = vsub.f32 %v195_v61, %v197_v54  ;;  %v249_v45 = vadd.f32 0.0001, %v247_v38 }
  0xb5   :  { %v210_v47 = vsel %vm508_vm4, %v208_v48, %v204_v36  ;;  %v209_v50 = vsel %vm508_vm4, %v206_v46, %v202_v37  ;;  %v212_v55 = vsel %vm523_vm5, %v204_v36, %v208_v48  ;;  %v211_v59 = vsel %vm523_vm5, %v202_v37, %v206_v46 }
  0xb6   :  { %v214_v52 = vadd.f32 %v210_v47, %v483_v56  ;;  %v213_v53 = vadd.f32 %v209_v50, %v485_v57  ;;  %v258_v57 = vadd.f32 %v220_v51, %v198_v5 }
  0xb8   :  { %v216_v62 = vadd.f32 %v214_v52, %v212_v55  ;;  %v215_v2 = vadd.f32 %v213_v53, %v211_v59  ;;  %v226_v3 = vpop.permute.xlu1 %225  ;;  %v224_v4 = vpop.permute.xlu0 %223  ;;  %v260_v23 = vadd.f32 0.0001, %v258_v57 }
  0xba   :  { %v218_v56 = vmul.f32 0.11111111, %v216_v62  ;;  %v217_v6 = vmul.f32 0.11111111, %v215_v2 }
  0xbc   :  { %v222_v10 = vsub.f32 %v218_v56, %v220_v51  ;;  %v221_v11 = vsub.f32 %v217_v6, %v219_v58  ;;  %v230_v13 = vpop.permute.xlu1 %229  ;;  %v228_v14 = vpop.permute.xlu0 %227 }
  0xbd   :  { %v232_v15 = vsel %vm508_vm4, %v230_v13, %v226_v3  ;;  %v234_v16 = vsel %vm523_vm5, %v226_v3, %v230_v13  ;;  %v231_v0 = vsel %vm508_vm4, %v228_v14, %v224_v4  ;;  %v233_v17 = vsel %vm523_vm5, %v224_v4, %v228_v14 }
  0xbe   :  { %v262_v18 = vadd.f32 %v222_v10, %v200_v8  ;;  %v261_v19 = vadd.f32 %v221_v11, %v199_v9  ;;  %v236_v20 = vadd.f32 %v232_v15, %v495_v63  ;;  %v235_v22 = vadd.f32 %v231_v0, %v497_v1 }
  0xbf   :  { %v246_v1 = vmul.f32 2.0, %v160_v49 }
  0xc0   :  { %v264_v25 = vadd.f32 0.0009, %v262_v18  ;;  %v263_v26 = vadd.f32 0.0009, %v261_v19  ;;  %v238_v28 = vadd.f32 %v236_v20, %v234_v16  ;;  %v237_v29 = vadd.f32 %v235_v22, %v233_v17 }
  0xc1   :  { %v248_v37 = vmul.f32 %v246_v1, %v542_v39 }
  0xc2   :  { %v266_v31 = vmul.f32 %v264_v25, %v260_v23  ;;  %v265_v12 = vmul.f32 %v263_v26, %v259_v24  ;;  %v240_v32 = vmul.f32 0.11111111, %v238_v28  ;;  %v239_v33 = vmul.f32 0.11111111, %v237_v29 }
  0xc3   :  { %v250_v44 = vadd.f32 0.0001, %v248_v37 }
  0xc4   :  { %306 = vrcp.f32 %v266_v31  ;;  %v244_v27 = vsub.f32 %v240_v32, %v242_v30  ;;  %v243_v63 = vsub.f32 %v239_v33, %v241_v21 }
  0xc5   :  { %308 = vrcp.f32 %v265_v12 }
  0xc6   :  { %v252_v35 = vmul.f32 2.0, %v244_v27  ;;  %v251_v36 = vmul.f32 2.0, %v243_v63 }
  0xc8   :  { %v254_v42 = vadd.f32 0.0009, %v252_v35  ;;  %v253_v43 = vadd.f32 0.0009, %v251_v36 }
  0xca   :  { %v256_v48 = vmul.f32 %v254_v42, %v250_v44  ;;  %v255_v47 = vmul.f32 %v253_v43, %v249_v45 }
  0xd1   :  { %v307_v46 = vpop.eup %306 }
  0xd2   :  { %v309_v50 = vpop.eup %308  ;;  %v270_v51 = vmul.f32 %v307_v46, %v256_v48 }
  0xd3   :  { %v268_v52 = vmul.f32 %v309_v50, %v255_v47 }
  0xd4   :  { %v272_v53 = vsub.f32 1.0, %v270_v51 }
  0xd5   :  { %v271_v54 = vsub.f32 1.0, %v268_v52 }
  0xd6   :  { %v274_v40 = vmul.f32 0.5, %v272_v53 }
  0xd7   :  { %v273_v49 = vmul.f32 0.5, %v271_v54 }
  0xd8   :  { %v276_v55 = vmax.f32 %v274_v40, 0.0 }
  0xd9   :  { %v275_v39 = vmax.f32 %v273_v49, 0.0 }
  0xda   :  { %v278_v58 = vmin.f32 %v276_v55, 1.0 }
  0xdb   :  { %v277_v41 = vmin.f32 %v275_v39, 1.0 }
  0xdc   :  { %280 = vst [vmem:[#allocation7 + $0x8] sm:$0xff] %v278_v58 }
  0xdd   :  { %279 = vst [vmem:[#allocation7] sm:$0xff] %v277_v41 }
  0xde   :  { %361 = shalt.err (!%p358_p0)
}
  0xdf   :  { %292 = dma.vmem_to_hbm [thread:$0]  %s287_s22, 256, %s586_s2, [#allocation4], %s377_s12, %s377_s12, %s378_s13  }
  0xe0   :  { %374 = dma.done.wait [#allocation4], 256  }
  0xe1   :  { %375 = vsyncadd [#allocation4], 4294967040 }
  0xe2   :  { %296 = vsyncpa [#allocation3], 1 }
  0xe3   :  { %297 = vsyncpa [#allocation6], 1 }
  0xe4   :  { %298 = vsyncpa [#allocation4], 1 }

</bundles_post_ra>
